<compile_context>
chip_gen: v5e
topology: v5e:2x2
jax: 0.10.0
libtpu: 0.0.40
codegen_flags: <defaults>
</compile_context>

<pallas_src>
import math

import jax
import jax.numpy as jnp
from jax import lax
from jax.experimental import pallas as pl
from jax.experimental.pallas import tpu as pltpu


def _round_up(x: int, m: int) -> int:
    return ((x + m - 1) // m) * m


def build_fixed_table(c_in: int, d_model: int) -> jnp.ndarray:
    """Deterministic sinusoidal table, matching FixedEmbedding.__init__."""
    position = jnp.arange(c_in, dtype=jnp.float32)[:, None]            # (c_in, 1)
    div_term = jnp.exp(
        jnp.arange(0, d_model, 2, dtype=jnp.float32)
        * -(math.log(10000.0) / d_model)
    )                                                                   # (ceil(d/2),)
    ang = position * div_term                                           # (c_in, ceil(d/2))
    w = jnp.zeros((c_in, d_model), dtype=jnp.float32)
    w = w.at[:, 0::2].set(jnp.sin(ang))
    w = w.at[:, 1::2].set(jnp.cos(ang[:, : d_model // 2]))
    return w


def _embed_kernel(idx_ref, w_ref, o_ref):
    # idx_ref: (TM, 1)        int32   -- token indices for this tile
    # w_ref:   (c_pad, d_pad) float32 -- zero-padded sinusoidal table (resident)
    # o_ref:   (TM, d_pad)    float32 -- lane-dense output tile
    tm = o_ref.shape[0]
    c_pad = w_ref.shape[0]
    # One-hot gather on the MXU: (TM, c_pad) one-hot @ (c_pad, d_pad) table.
    # Exact: each output row sums exactly one table element (out-of-range
    # indices -> all-zero row -> zero embedding; PyTorch would raise).
    iota = lax.broadcasted_iota(jnp.int32, (tm, c_pad), 1)
    onehot = (iota == idx_ref[...]).astype(jnp.float32)
    o_ref[...] = jnp.dot(onehot, w_ref[...], preferred_element_type=jnp.float32)


def fixed_embedding_pallas(x: jnp.ndarray, w: jnp.ndarray, *, tile_rows: int = 1024) -> jnp.ndarray:
    """Pallas equivalent of FixedEmbedding.forward for an integer index tensor x.

    Returns x.shape + (d_model,) float32.
    """
    orig_shape = tuple(x.shape)
    c_in, d_model = w.shape
    n = int(math.prod(orig_shape)) if orig_shape else 1

    # Pad table: vocab to a multiple of 128 (one-hot lane dim / MXU K),
    # d_model to a multiple of 128 (lane-dense output stores).
    c_pad = max(128, _round_up(c_in, 128))
    d_pad = max(128, _round_up(d_model, 128))
    w_pad = jnp.zeros((c_pad, d_pad), jnp.float32).at[:c_in, :d_model].set(
        w.astype(jnp.float32)
    )

    # Tile the flattened token axis. TM is a multiple of 8 (sublane), capped
    # by tile_rows and by a VMEM budget (out is double-buffered, the (TM,1)
    # index tile is lane-padded to 128 in VMEM, plus the one-hot temp), so the
    # kernel stays well under the default scoped VMEM limit on v5e/v6e/v7x
    # for any d_model.
    vmem_budget = 8 * 1024 * 1024
    bytes_per_row = 4 * (2 * d_pad + c_pad + 2 * 128)
    tm_cap = max(8, (vmem_budget // bytes_per_row) // 8 * 8)
    tm = min(tile_rows, tm_cap, _round_up(n, 8))
    n_pad = _round_up(n, tm)

    # Padded rows use index 0; they are sliced away below. The (n_pad, 1)
    # index stream is tiny HBM traffic (4 B/token) compared to the output
    # (4*d_model B/token), so its sublane-strided VMEM fill is negligible and
    # fully hidden by double-buffering.
    idx = jnp.zeros((n_pad, 1), jnp.int32).at[:n, 0].set(
        x.reshape(-1).astype(jnp.int32)
    )

    grid = (n_pad // tm,)

    # Advisory cost hint: dominant cost is the output writeback; the one-hot
    # matmul flops are reported so XLA schedules around the custom call sanely.
    cost = pl.CostEstimate(
        flops=2 * n_pad * c_pad * d_pad,
        transcendentals=0,
        bytes_accessed=n_pad * 4 + c_pad * d_pad * 4 + n_pad * d_pad * 4,
    )

    out = pl.pallas_call(
        _embed_kernel,
        out_shape=jax.ShapeDtypeStruct((n_pad, d_pad), jnp.float32),
        grid_spec=pltpu.PrefetchScalarGridSpec(
            num_scalar_prefetch=0,
            grid=grid,
            in_specs=[
                pl.BlockSpec((tm, 1), lambda i: (i, 0)),          # indices tile
                pl.BlockSpec((c_pad, d_pad), lambda i: (0, 0)),   # table (resident)
            ],
            out_specs=pl.BlockSpec((tm, d_pad), lambda i: (i, 0)),
        ),
        compiler_params=pltpu.CompilerParams(
            dimension_semantics=("parallel",),
        ),
        cost_estimate=cost,
    )(idx, w_pad)

    out = out[:n, :d_model]
    return out.reshape(*orig_shape, d_model)


def fixed_embedding(x: jnp.ndarray, w: jnp.ndarray, *, min_tokens_for_pallas: int = 4096) -> jnp.ndarray:
    """Size-thresholded dispatcher: for tiny inputs a plain XLA gather beats the
    fixed per-pallas_call overhead; large inputs take the tiled Pallas path."""
    n = int(math.prod(x.shape)) if x.shape else 1
    if n < min_tokens_for_pallas:
        return jnp.take(w, x.reshape(-1).astype(jnp.int32), axis=0).reshape(
            *x.shape, w.shape[1]
        )
    return fixed_embedding_pallas(x, w)


if __name__ == "__main__":
    # Shapes consistent with the module: vocabulary c_in, hidden d_model,
    # integer index input of shape (batch, seq).
    c_in, d_model = 24, 32
    B, S = 2, 8

    key = jax.random.PRNGKey(0)
    x = jax.random.randint(key, (B, S), minval=0, maxval=c_in, dtype=jnp.int32)
    w = build_fixed_table(c_in, d_model)

    # Run the Pallas kernel path explicitly (single-tile grid at this size).
    out = jax.block_until_ready(fixed_embedding_pallas(x, w))
    ref = jnp.take(w, x.reshape(-1), axis=0).reshape(B, S, d_model)
    assert out.shape == (B, S, d_model)
    assert out.dtype == jnp.float32
    assert jnp.allclose(out, ref, atol=1e-6), "mismatch vs reference gather (small)"

    # Second check: exercises the multi-tile grid, the partial last tile and
    # the pad/slice path (N = 1200 -> 2 tiles of 1024 with padding).
    x2 = jax.random.randint(jax.random.PRNGKey(1), (4, 300), 0, c_in, dtype=jnp.int32)
    out2 = jax.block_until_ready(fixed_embedding_pallas(x2, w))
    ref2 = jnp.take(w, x2.reshape(-1), axis=0).reshape(4, 300, d_model)
    assert jnp.allclose(out2, ref2, atol=1e-6), "mismatch vs reference gather (tiled)"

    print("KERNEL_OK")
</pallas_src>

<mosaic_0001>
module attributes {stable_mosaic.version = 11 : i64} {
  func.func @_embed_kernel(%arg0: i32, %arg1: memref<16x1xi32, #tpu.memory_space<vmem>>, %arg2: memref<128x128xf32, #tpu.memory_space<vmem>>, %arg3: memref<16x128xf32, #tpu.memory_space<vmem>>) attributes {dimension_semantics = [#tpu.dimension_semantics<parallel>], iteration_bounds = array<i64: 1>, scalar_prefetch = 0 : i64, scratch_operands = 0 : i64, tpu.core_type = #tpu.core_type<tc>, window_params = [{transform_indices = @transform_0, window_bounds = array<i64: 16, 1>}, {pipeline_mode = #tpu.pipeline_mode<synchronous>, transform_indices = @transform_1, window_bounds = array<i64: 128, 128>}, {transform_indices = @transform_2, window_bounds = array<i64: 16, 128>}]} {
    %0 = tpu.iota {dimensions = array<i32: 1>} : vector<16x128xi32>
    %c0 = arith.constant 0 : index
    %c0_0 = arith.constant 0 : index
    %1 = vector.load %arg1[%c0, %c0_0] : memref<16x1xi32, #tpu.memory_space<vmem>>, vector<16x1xi32>
    %2 = vector.broadcast %1 : vector<16x1xi32> to vector<16x128xi32>
    %3 = arith.cmpi eq, %0, %2 : vector<16x128xi32>
    %4 = arith.extui %3 : vector<16x128xi1> to vector<16x128xi32>
    %5 = arith.sitofp %4 : vector<16x128xi32> to vector<16x128xf32>
    %c0_1 = arith.constant 0 : index
    %c0_2 = arith.constant 0 : index
    %6 = vector.load %arg2[%c0_1, %c0_2] : memref<128x128xf32, #tpu.memory_space<vmem>>, vector<128x128xf32>
    %cst = arith.constant dense<0.000000e+00> : vector<16x128xf32>
    %7 = tpu.matmul %5, %6, %cst {dimension_numbers = #tpu.dot_dimension_numbers<[1], [0], [0], [1], [0, 0, 1, 1], [], []>} : vector<16x128xf32>, vector<128x128xf32>, vector<16x128xf32> -> vector<16x128xf32>
    %c0_3 = arith.constant 0 : index
    %c0_4 = arith.constant 0 : index
    %8 = vector.load %arg3[%c0_3, %c0_4] : memref<16x128xf32, #tpu.memory_space<vmem>>, vector<16x128xf32>
    tpu.vector_store %arg3[%c0_3, %c0_4], %7 {strides = array<i32>} : memref<16x128xf32, #tpu.memory_space<vmem>>, vector<16x128xf32>,
    return
  }
  func.func @transform_0(%arg0: i32) -> (i32, i32) {
    %c0_i32 = arith.constant 0 : i32
    %c0_i32_0 = arith.constant 0 : i32
    return %arg0, %c0_i32 : i32, i32
  }
  func.func @transform_1(%arg0: i32) -> (i32, i32) {
    %c0_i32 = arith.constant 0 : i32
    %c0_i32_0 = arith.constant 0 : i32
    %c0_i32_1 = arith.constant 0 : i32
    return %c0_i32, %c0_i32_0 : i32, i32
  }
  func.func @transform_2(%arg0: i32) -> (i32, i32) {
    %c0_i32 = arith.constant 0 : i32
    %c0_i32_0 = arith.constant 0 : i32
    return %arg0, %c0_i32 : i32, i32
  }
}

</mosaic_0001>

<bundles_post_ra>
// kernel: tpu_custom_call.1
= control target key start
LH: loop header
LB: loop body
LE: loop exit
PB: predicated region body
PF: predicated region fallthrough
CT: control target
= control target key end

     0   :  { %7 = vsyncpa [#allocation3], 0  ;;  %s222_s0 = inlined_call_operand.vmem [shape: s32[16,1], index: 0, kind: input, shape index: {}]   ;;  %s223_s1 = inlined_call_operand.hbm [shape: f32[128,128], index: 1, kind: input, shape index: {}]   ;;  %s224_s2 = inlined_call_operand.hbm [shape: f32[16,128], index: 2, kind: output, shape index: {}]  }
   0x1   :  { %8 = vsyncpa [#allocation4], 0  ;;  %s15_s11 = sshll.u32 %s223_s1, 4  ;;  %s183_s12 = smov [#allocation2]   ;;  %s16_s11 = int_to_ptr.hbm [resolvable:$true] %s15_s11 }
   0x2   :  { %s17_s13 = sshll.u32 %s183_s12, 4  ;;  %s184_s14 = smov 128   ;;  %s18_s13 = int_to_ptr.vmem [resolvable:$true] %s17_s13 }
   0x3   :  { %s185_s15 = smov 8  }
   0x4   :  { %23 = dma.hbm_to_vmem [thread:$0]  %s16_s11, 2048, %s18_s13, [#allocation3], %s184_s14, %s184_s14, %s185_s15  }
   0x5   :  { %179 = dma.done.wait [#allocation3], 2048  }
   0x6   :  { %180 = vsyncadd [#allocation3], 4294965248  ;;  %v186_v0 = vmov 0   ;;  %v30_v1 = vld [vmem:[%s222_s0] sm:$0xff]  ;;  %v59_v2 = vld [vmem:[#allocation2 + $0x78] sm:$0xff]  ;;  %v28_v19 = vlaneseq  ;;  %v187_v22 = vmov 1.0  }
   0x7   :  { %130 = vset.pattern.permute.xlu0 %v186_v0  ;;  %60 = vmatpush.msra.mxu0 %v59_v2  ;;  %v58_v3 = vld [vmem:[#allocation2 + $0x70] sm:$0xff]  ;;  %v57_v4 = vld [vmem:[#allocation2 + $0x68] sm:$0xff]  ;;  %v56_v5 = vld [vmem:[#allocation2 + $0x60] sm:$0xff]  ;;  %s91_s22 = sshll.u32 %s224_s2, 4  ;;  %s92_s22 = int_to_ptr.hbm [resolvable:$true] %s91_s22 }
   0x8   :  { %33 = vperm.xlu0 %130, %v30_v1   ;;  %108 = vmatpush.msra.mxu1 %v59_v2  ;;  %v31_v6 = vld [vmem:[%s222_s0 + $0x8] sm:$0xff]  ;;  %v55_v7 = vld [vmem:[#allocation2 + $0x58] sm:$0xff]  ;;  %v54_v8 = vld [vmem:[#allocation2 + $0x50] sm:$0xff]  ;;  %v29_v20 = vand.u32 127, %v28_v19  ;;  %s188_s0 = smov [#allocation5]  }
   0x9   :  { %61 = vmatpush.msra.mxu0 %v58_v3  ;;  %v53_v9 = vld [vmem:[#allocation2 + $0x48] sm:$0xff]  ;;  %v52_v10 = vld [vmem:[#allocation2 + $0x40] sm:$0xff]  ;;  %v51_v11 = vld [vmem:[#allocation2 + $0x38] sm:$0xff]  ;;  %s89_s19 = sshll.u32 %s188_s0, 4  ;;  %s90_s19 = int_to_ptr.vmem [resolvable:$true] %s89_s19 }
   0xa   :  { %109 = vmatpush.msra.mxu1 %v58_v3  ;;  %v50_v12 = vld [vmem:[#allocation2 + $0x30] sm:$0xff]  ;;  %v49_v13 = vld [vmem:[#allocation2 + $0x28] sm:$0xff]  ;;  %v48_v14 = vld [vmem:[#allocation2 + $0x20] sm:$0xff] }
   0xb   :  { %62 = vmatpush.msra.mxu0 %v57_v4  ;;  %v47_v15 = vld [vmem:[#allocation2 + $0x18] sm:$0xff]  ;;  %v46_v16 = vld [vmem:[#allocation2 + $0x10] sm:$0xff]  ;;  %v45_v17 = vld [vmem:[#allocation2 + $0x8] sm:$0xff] }
   0xc   :  { %110 = vmatpush.msra.mxu1 %v57_v4  ;;  %v44_v18 = vld [vmem:[#allocation2] sm:$0xff] }
   0xd   :  { %63 = vmatpush.msra.mxu0 %v56_v5 }
   0xe   :  { %111 = vmatpush.msra.mxu1 %v56_v5 }
   0xf   :  { %64 = vmatpush.msra.mxu0 %v55_v7 }
  0x10   :  { %36 = vperm.xlu0 %130, %v31_v6   ;;  %112 = vmatpush.msra.mxu1 %v55_v7 }
  0x11   :  { %65 = vmatpush.msra.mxu0 %v54_v8 }
  0x12   :  { %113 = vmatpush.msra.mxu1 %v54_v8 }
  0x13   :  { %66 = vmatpush.msra.mxu0 %v53_v9 }
  0x14   :  { %114 = vmatpush.msra.mxu1 %v53_v9 }
  0x15   :  { %67 = vmatpush.msra.mxu0 %v52_v10 }
  0x16   :  { %115 = vmatpush.msra.mxu1 %v52_v10 }
  0x17   :  { %68 = vmatpush.msra.mxu0 %v51_v11 }
  0x18   :  { %116 = vmatpush.msra.mxu1 %v51_v11 }
  0x19   :  { %69 = vmatpush.msra.mxu0 %v50_v12 }
  0x1a   :  { %117 = vmatpush.msra.mxu1 %v50_v12 }
  0x1b   :  { %70 = vmatpush.msra.mxu0 %v49_v13 }
  0x1c   :  { %118 = vmatpush.msra.mxu1 %v49_v13 }
  0x1d   :  { %71 = vmatpush.msra.mxu0 %v48_v14 }
  0x1e   :  { %119 = vmatpush.msra.mxu1 %v48_v14 }
  0x1f   :  { %72 = vmatpush.msra.mxu0 %v47_v15 }
  0x20   :  { %120 = vmatpush.msra.mxu1 %v47_v15 }
  0x21   :  { %73 = vmatpush.msra.mxu0 %v46_v16 }
  0x22   :  { %121 = vmatpush.msra.mxu1 %v46_v16 }
  0x23   :  { %74 = vmatpush.msra.mxu0 %v45_v17 }
  0x24   :  { %122 = vmatpush.msra.mxu1 %v45_v17 }
  0x25   :  { %75 = vmatpush.msra.mxu0 %v44_v18 }
  0x26   :  { %123 = vmatpush.msra.mxu1 %v44_v18 }
  0x7a   :  { %v34_v21 = vpop.permute.xlu0 %33 }
  0x7b   :  { %vm38_vm0 = vcmp.eq.s32.totalorder %v29_v20, %v34_v21 }
  0x7c   :  { %106 = vmatmul.msk.f32.vlgmr.msra.gmra.mxu0 %vm38_vm0, %v187_v22 }
  0x82   :  { %v37_v23 = vpop.permute.xlu0 %36 }
  0x83   :  { %vm39_vm1 = vcmp.eq.s32.totalorder %v29_v20, %v37_v23 }
  0x84   :  { %107 = vmatmul.msk.f32.vlgmr.msra.gmra.mxu1 %vm39_vm1, %v187_v22 }
  0xf9   :  { %v77_v24 = vpop.f32.mrf.mxu0 }
  0xfa   :  { %83 = vst [vmem:[#allocation5] sm:$0xff] %v77_v24 }
 0x101   :  { %v80_v25 = vpop.f32.mrf.mxu1 }
 0x102   :  { %84 = vst [vmem:[#allocation5 + $0x8] sm:$0xff] %v80_v25 }
 0x103   :  { %97 = dma.vmem_to_hbm [thread:$0]  %s90_s19, 256, %s92_s22, [#allocation4], %s184_s14, %s184_s14, %s185_s15  }
 0x104   :  { %181 = dma.done.wait [#allocation4], 256  }
 0x105   :  { %182 = vsyncadd [#allocation4], 4294967040 }
 0x106   :  { %102 = vsyncpa [#allocation3], 1 }
 0x107   :  { %103 = vsyncpa [#allocation4], 1 }

</bundles_post_ra>
